<compile_context>
chip_gen: v7x
topology: tpu7x:2x2x1
jax: 0.10.0
libtpu: 0.0.40
codegen_flags: <defaults>
</compile_context>

<pallas_src>
import functools

import jax
import jax.numpy as jnp
from jax import lax
from jax.experimental import pallas as pl
from jax.experimental.pallas import tpu as pltpu


def _round_up(v, m):
    return ((v + m - 1) // m) * m


def _cdl_kernel(bi_ref, bj_ref, qT_ref, kT_ref, out_ref, *, n, tile):
    """One upper-triangular (row-tile, col-tile) block pair of the N x N pair matrix.

    qT_ref / kT_ref: (D, tile) transposed code blocks (codes on lanes).
    out_ref:         (1, 1, tile) lane-dense per-pair partial sums.
    """
    T = tile
    p = pl.program_id(0)
    bi = bi_ref[p]
    bj = bj_ref[p]

    # Hoisted casts: one f32 copy of each block per grid step.
    qT = qT_ref[...].astype(jnp.float32)          # (D, T)  query codes, codes on lanes
    kT0 = kT_ref[...].astype(jnp.float32)         # (D, T)  key codes,   codes on lanes

    row_lim = n - bi * T                          # number of valid query rows in this tile
    col_lim = n - bj * T                          # number of valid key cols in this tile
    is_offdiag = bj != bi                         # off-diagonal blocks are entirely strict-upper

    # Offset-independent iotas / masks, hoisted out of the offset loop.
    c_ids = lax.broadcasted_iota(jnp.int32, (8, T), 1)   # lane position within the tile
    s_ids = lax.broadcasted_iota(jnp.int32, (8, T), 0)   # sub-offset within a group of 8
    row_valid = c_ids < row_lim

    # Key-column index row, rolled in lockstep with the key block so masks are
    # independent of the rotate direction convention.
    ids0 = lax.broadcasted_iota(jnp.int32, (8, T), 1)

    n_groups = T // 8

    def group_body(og, carry):
        del og
        k_roll, ids, acc = carry

        dist = jnp.zeros((8, T), jnp.float32)
        cols = jnp.zeros((8, T), jnp.int32)
        k = k_roll
        cid = ids
        for s in range(8):                        # static: all roll shifts are compile-time 1
            if s > 0:
                k = pltpu.roll(k, shift=1, axis=1)
                cid = pltpu.roll(cid, shift=1, axis=1)
            # L1 distance of every query (lane c) to the key column currently aligned with it.
            d_row = jnp.sum(jnp.abs(qT - k), axis=0, keepdims=True)   # (1, T), dense lanes
            sel = s_ids == s
            dist = jnp.where(sel, d_row, dist)    # place into sublane s -> dense (8, T)
            cols = jnp.where(sel, cid, cols)
        # Advance the carried rotation to the start of the next group (8 steps total).
        k_next = pltpu.roll(k, shift=1, axis=1)
        ids_next = pltpu.roll(cid, shift=1, axis=1)

        sim = jnp.exp(-dist)                                          # one dense (8, T) EUP batch
        col_valid = cols < col_lim                                    # N-padding mask (cols)
        upper = jnp.logical_or(is_offdiag, cols > c_ids)              # strict upper triangle
        mask = row_valid & col_valid & upper
        acc = acc + jnp.where(mask, sim, 0.0)
        return k_next, ids_next, acc

    init = (kT0, ids0, jnp.zeros((8, T), jnp.float32))
    _, _, acc = lax.fori_loop(0, n_groups, group_body, init)

    # Single lane-dense store per pair (no output revisits across grid steps).
    out_ref[...] = jnp.sum(acc, axis=0, keepdims=True).reshape(1, 1, T)


def codebook_diversity_loss(x, *, tile=128):
    assert x.ndim == 2, "expected codebook of shape (num_codes, code_dim)"
    n, d = x.shape

    T = max(128, _round_up(tile, 128))            # lane-aligned tile of codes
    n_pad = _round_up(n, T)
    gi = n_pad // T

    xp = x if n_pad == n else jnp.pad(x, ((0, n_pad - n), (0, 0)))
    xt = jnp.transpose(xp)                        # (d, n_pad): codes on the lane axis

    # Upper-triangular block pairs only (bi <= bj).  Every pair costs the same
    # amount of work, so a contiguous split of the "parallel" axis is balanced
    # across the two v7x TensorCores.
    pairs = [(i, j) for i in range(gi) for j in range(i, gi)]
    num_pairs = len(pairs)
    bi_arr = jnp.array([pr[0] for pr in pairs], dtype=jnp.int32)
    bj_arr = jnp.array([pr[1] for pr in pairs], dtype=jnp.int32)

    itemsize = jnp.dtype(x.dtype).itemsize
    kernel = functools.partial(_cdl_kernel, n=n, tile=T)

    partials = pl.pallas_call(
        kernel,
        out_shape=jax.ShapeDtypeStruct((num_pairs, 1, T), jnp.float32),
        grid_spec=pltpu.PrefetchScalarGridSpec(
            num_scalar_prefetch=2,
            grid=(num_pairs,),
            in_specs=[
                pl.BlockSpec((d, T), lambda p, bi, bj: (0, bi[p])),   # query block (transposed)
                pl.BlockSpec((d, T), lambda p, bi, bj: (0, bj[p])),   # key block   (transposed)
            ],
            out_specs=pl.BlockSpec((1, 1, T), lambda p, bi, bj: (p, 0, 0)),
        ),
        compiler_params=pltpu.CompilerParams(
            dimension_semantics=("parallel",),
        ),
        cost_estimate=pl.CostEstimate(
            flops=3 * num_pairs * T * T * d,
            transcendentals=num_pairs * T * T,
            bytes_accessed=2 * num_pairs * d * T * itemsize + num_pairs * T * 4,
        ),
    )(bi_arr, bj_arr, xt, xt)

    return jnp.sum(partials) / jnp.float32(n * n)


def codebook_diversity_loss_ref(x):
    n = x.shape[0]
    dist = jnp.sum(jnp.abs(x[:, None, :] - x[None, :, :]), axis=-1)
    sim = jnp.exp(-dist)
    mask = jnp.triu(jnp.ones((n, n), dtype=bool), k=1)
    return jnp.sum(jnp.where(mask, sim, 0.0)) / (n * n)


if __name__ == "__main__":
    key = jax.random.PRNGKey(0)
    k1, k2, k3 = jax.random.split(key, 3)

    # small codebook: 20 codes x 16 dims (single block, heavy N-padding + triangle mask)
    x1 = 0.1 * jax.random.normal(k1, (20, 16), dtype=jnp.float32)
    out1 = jax.block_until_ready(codebook_diversity_loss(x1))
    ref1 = jax.block_until_ready(codebook_diversity_loss_ref(x1))
    assert out1.shape == ()
    assert jnp.allclose(out1, ref1, rtol=1e-5, atol=1e-6), (out1, ref1)

    # padded multi-tile case: 200 codes x 32 dims (2x2 block grid -> 3 pairs, padded last tile)
    x2 = 0.05 * jax.random.normal(k2, (200, 32), dtype=jnp.float32)
    out2 = jax.block_until_ready(codebook_diversity_loss(x2))
    ref2 = jax.block_until_ready(codebook_diversity_loss_ref(x2))
    assert jnp.allclose(out2, ref2, rtol=1e-5, atol=1e-6), (out2, ref2)

    # exact multi-tile case: 256 codes x 64 dims (diagonal + off-diagonal pairs, no padding)
    x3 = 0.05 * jax.random.normal(k3, (256, 64), dtype=jnp.float32)
    out3 = jax.block_until_ready(codebook_diversity_loss(x3))
    ref3 = jax.block_until_ready(codebook_diversity_loss_ref(x3))
    assert jnp.allclose(out3, ref3, rtol=1e-5, atol=1e-6), (out3, ref3)

    print("KERNEL_OK")
</pallas_src>

<mosaic_0001>
module attributes {stable_mosaic.version = 11 : i64} {
  func.func @_cdl_kernel(%arg0: i32, %arg1: memref<1xi32, #tpu.memory_space<smem>>, %arg2: memref<1xi32, #tpu.memory_space<smem>>, %arg3: memref<16x128xf32, #tpu.memory_space<vmem>>, %arg4: memref<16x128xf32, #tpu.memory_space<vmem>>, %arg5: memref<1x1x128xf32, #tpu.memory_space<vmem>>) attributes {dimension_semantics = [#tpu.dimension_semantics<parallel>], iteration_bounds = array<i64: 1>, scalar_prefetch = 2 : i64, scratch_operands = 0 : i64, tpu.core_type = #tpu.core_type<tc>, window_params = [{transform_indices = @transform_0, window_bounds = array<i64: 16, 128>}, {transform_indices = @transform_1, window_bounds = array<i64: 16, 128>}, {transform_indices = @transform_2, window_bounds = array<i64: 1, 1, 128>}]} {
    %0 = arith.index_cast %arg0 : i32 to index
    %1 = memref.load %arg1[%0] : memref<1xi32, #tpu.memory_space<smem>>
    %2 = arith.index_cast %arg0 : i32 to index
    %3 = memref.load %arg2[%2] : memref<1xi32, #tpu.memory_space<smem>>
    %c0 = arith.constant 0 : index
    %c0_0 = arith.constant 0 : index
    %4 = vector.load %arg3[%c0, %c0_0] : memref<16x128xf32, #tpu.memory_space<vmem>>, vector<16x128xf32>
    %c0_1 = arith.constant 0 : index
    %c0_2 = arith.constant 0 : index
    %5 = vector.load %arg4[%c0_1, %c0_2] : memref<16x128xf32, #tpu.memory_space<vmem>>, vector<16x128xf32>
    %c128_i32 = arith.constant 128 : i32
    %6 = arith.muli %1, %c128_i32 : i32
    %c20_i32 = arith.constant 20 : i32
    %7 = arith.subi %c20_i32, %6 : i32
    %c128_i32_3 = arith.constant 128 : i32
    %8 = arith.muli %3, %c128_i32_3 : i32
    %c20_i32_4 = arith.constant 20 : i32
    %9 = arith.subi %c20_i32_4, %8 : i32
    %10 = arith.cmpi ne, %3, %1 : i32
    %11 = tpu.iota {dimensions = array<i32: 1>} : vector<8x128xi32>
    %12 = tpu.iota {dimensions = array<i32: 0>} : vector<8x128xi32>
    %13 = vector.broadcast %7 : i32 to vector<8x128xi32>
    %14 = arith.cmpi slt, %11, %13 : vector<8x128xi32>
    %15 = tpu.iota {dimensions = array<i32: 1>} : vector<8x128xi32>
    %cst = arith.constant 0.000000e+00 : f32
    %16 = vector.broadcast %cst : f32 to vector<8x128xf32>
    %c0_i32 = arith.constant 0 : i32
    %c16_i32 = arith.constant 16 : i32
    %17 = arith.addi %c0_i32, %c16_i32 : i32
    %c1_i32 = arith.constant 1 : i32
    %18:3 = scf.for %arg6 = %c0_i32 to %17 step %c1_i32 iter_args(%arg7 = %5, %arg8 = %15, %arg9 = %16) -> (vector<16x128xf32>, vector<8x128xi32>, vector<8x128xf32>)  : i32 {
      %cst_9 = arith.constant 0.000000e+00 : f32
      %23 = vector.broadcast %cst_9 : f32 to vector<8x128xf32>
      %c0_i32_10 = arith.constant 0 : i32
      %24 = vector.broadcast %c0_i32_10 : i32 to vector<8x128xi32>
      %25 = arith.subf %4, %arg7 : vector<16x128xf32>
      %26 = math.absf %25 : vector<16x128xf32>
      %cst_11 = arith.constant dense<0.000000e+00> : vector<128xf32>
      %27 = vector.multi_reduction <add>, %26, %cst_11 [0] : vector<16x128xf32> to vector<128xf32>
      %28 = vector.shape_cast %27 : vector<128xf32> to vector<1x128xf32>
      %c0_i32_12 = arith.constant 0 : i32
      %29 = vector.broadcast %c0_i32_12 : i32 to vector<8x128xi32>
      %30 = arith.cmpi eq, %12, %29 : vector<8x128xi32>
      %31 = vector.shape_cast %28 : vector<1x128xf32> to vector<1x128xf32>
      %32 = vector.broadcast %31 : vector<1x128xf32> to vector<8x128xf32>
      %33 = arith.select %30, %32, %23 : vector<8x128xi1>, vector<8x128xf32>
      %34 = arith.select %30, %arg8, %24 : vector<8x128xi1>, vector<8x128xi32>
      %c1_i32_13 = arith.constant 1 : i32
      %35 = tpu.dynamic_rotate %arg7 by %c1_i32_13 dim 1 : vector<16x128xf32>, i32 -> vector<16x128xf32>
      %c1_i32_14 = arith.constant 1 : i32
      %36 = tpu.dynamic_rotate %arg8 by %c1_i32_14 dim 1 : vector<8x128xi32>, i32 -> vector<8x128xi32>
      %37 = arith.subf %4, %35 : vector<16x128xf32>
      %38 = math.absf %37 : vector<16x128xf32>
      %cst_15 = arith.constant dense<0.000000e+00> : vector<128xf32>
      %39 = vector.multi_reduction <add>, %38, %cst_15 [0] : vector<16x128xf32> to vector<128xf32>
      %40 = vector.shape_cast %39 : vector<128xf32> to vector<1x128xf32>
      %c1_i32_16 = arith.constant 1 : i32
      %41 = vector.broadcast %c1_i32_16 : i32 to vector<8x128xi32>
      %42 = arith.cmpi eq, %12, %41 : vector<8x128xi32>
      %43 = vector.shape_cast %40 : vector<1x128xf32> to vector<1x128xf32>
      %44 = vector.broadcast %43 : vector<1x128xf32> to vector<8x128xf32>
      %45 = arith.select %42, %44, %33 : vector<8x128xi1>, vector<8x128xf32>
      %46 = arith.select %42, %36, %34 : vector<8x128xi1>, vector<8x128xi32>
      %c1_i32_17 = arith.constant 1 : i32
      %47 = tpu.dynamic_rotate %35 by %c1_i32_17 dim 1 : vector<16x128xf32>, i32 -> vector<16x128xf32>
      %c1_i32_18 = arith.constant 1 : i32
      %48 = tpu.dynamic_rotate %36 by %c1_i32_18 dim 1 : vector<8x128xi32>, i32 -> vector<8x128xi32>
      %49 = arith.subf %4, %47 : vector<16x128xf32>
      %50 = math.absf %49 : vector<16x128xf32>
      %cst_19 = arith.constant dense<0.000000e+00> : vector<128xf32>
      %51 = vector.multi_reduction <add>, %50, %cst_19 [0] : vector<16x128xf32> to vector<128xf32>
      %52 = vector.shape_cast %51 : vector<128xf32> to vector<1x128xf32>
      %c2_i32 = arith.constant 2 : i32
      %53 = vector.broadcast %c2_i32 : i32 to vector<8x128xi32>
      %54 = arith.cmpi eq, %12, %53 : vector<8x128xi32>
      %55 = vector.shape_cast %52 : vector<1x128xf32> to vector<1x128xf32>
      %56 = vector.broadcast %55 : vector<1x128xf32> to vector<8x128xf32>
      %57 = arith.select %54, %56, %45 : vector<8x128xi1>, vector<8x128xf32>
      %58 = arith.select %54, %48, %46 : vector<8x128xi1>, vector<8x128xi32>
      %c1_i32_20 = arith.constant 1 : i32
      %59 = tpu.dynamic_rotate %47 by %c1_i32_20 dim 1 : vector<16x128xf32>, i32 -> vector<16x128xf32>
      %c1_i32_21 = arith.constant 1 : i32
      %60 = tpu.dynamic_rotate %48 by %c1_i32_21 dim 1 : vector<8x128xi32>, i32 -> vector<8x128xi32>
      %61 = arith.subf %4, %59 : vector<16x128xf32>
      %62 = math.absf %61 : vector<16x128xf32>
      %cst_22 = arith.constant dense<0.000000e+00> : vector<128xf32>
      %63 = vector.multi_reduction <add>, %62, %cst_22 [0] : vector<16x128xf32> to vector<128xf32>
      %64 = vector.shape_cast %63 : vector<128xf32> to vector<1x128xf32>
      %c3_i32 = arith.constant 3 : i32
      %65 = vector.broadcast %c3_i32 : i32 to vector<8x128xi32>
      %66 = arith.cmpi eq, %12, %65 : vector<8x128xi32>
      %67 = vector.shape_cast %64 : vector<1x128xf32> to vector<1x128xf32>
      %68 = vector.broadcast %67 : vector<1x128xf32> to vector<8x128xf32>
      %69 = arith.select %66, %68, %57 : vector<8x128xi1>, vector<8x128xf32>
      %70 = arith.select %66, %60, %58 : vector<8x128xi1>, vector<8x128xi32>
      %c1_i32_23 = arith.constant 1 : i32
      %71 = tpu.dynamic_rotate %59 by %c1_i32_23 dim 1 : vector<16x128xf32>, i32 -> vector<16x128xf32>
      %c1_i32_24 = arith.constant 1 : i32
      %72 = tpu.dynamic_rotate %60 by %c1_i32_24 dim 1 : vector<8x128xi32>, i32 -> vector<8x128xi32>
      %73 = arith.subf %4, %71 : vector<16x128xf32>
      %74 = math.absf %73 : vector<16x128xf32>
      %cst_25 = arith.constant dense<0.000000e+00> : vector<128xf32>
      %75 = vector.multi_reduction <add>, %74, %cst_25 [0] : vector<16x128xf32> to vector<128xf32>
      %76 = vector.shape_cast %75 : vector<128xf32> to vector<1x128xf32>
      %c4_i32 = arith.constant 4 : i32
      %77 = vector.broadcast %c4_i32 : i32 to vector<8x128xi32>
      %78 = arith.cmpi eq, %12, %77 : vector<8x128xi32>
      %79 = vector.shape_cast %76 : vector<1x128xf32> to vector<1x128xf32>
      %80 = vector.broadcast %79 : vector<1x128xf32> to vector<8x128xf32>
      %81 = arith.select %78, %80, %69 : vector<8x128xi1>, vector<8x128xf32>
      %82 = arith.select %78, %72, %70 : vector<8x128xi1>, vector<8x128xi32>
      %c1_i32_26 = arith.constant 1 : i32
      %83 = tpu.dynamic_rotate %71 by %c1_i32_26 dim 1 : vector<16x128xf32>, i32 -> vector<16x128xf32>
      %c1_i32_27 = arith.constant 1 : i32
      %84 = tpu.dynamic_rotate %72 by %c1_i32_27 dim 1 : vector<8x128xi32>, i32 -> vector<8x128xi32>
      %85 = arith.subf %4, %83 : vector<16x128xf32>
      %86 = math.absf %85 : vector<16x128xf32>
      %cst_28 = arith.constant dense<0.000000e+00> : vector<128xf32>
      %87 = vector.multi_reduction <add>, %86, %cst_28 [0] : vector<16x128xf32> to vector<128xf32>
      %88 = vector.shape_cast %87 : vector<128xf32> to vector<1x128xf32>
      %c5_i32 = arith.constant 5 : i32
      %89 = vector.broadcast %c5_i32 : i32 to vector<8x128xi32>
      %90 = arith.cmpi eq, %12, %89 : vector<8x128xi32>
      %91 = vector.shape_cast %88 : vector<1x128xf32> to vector<1x128xf32>
      %92 = vector.broadcast %91 : vector<1x128xf32> to vector<8x128xf32>
      %93 = arith.select %90, %92, %81 : vector<8x128xi1>, vector<8x128xf32>
      %94 = arith.select %90, %84, %82 : vector<8x128xi1>, vector<8x128xi32>
      %c1_i32_29 = arith.constant 1 : i32
      %95 = tpu.dynamic_rotate %83 by %c1_i32_29 dim 1 : vector<16x128xf32>, i32 -> vector<16x128xf32>
      %c1_i32_30 = arith.constant 1 : i32
      %96 = tpu.dynamic_rotate %84 by %c1_i32_30 dim 1 : vector<8x128xi32>, i32 -> vector<8x128xi32>
      %97 = arith.subf %4, %95 : vector<16x128xf32>
      %98 = math.absf %97 : vector<16x128xf32>
      %cst_31 = arith.constant dense<0.000000e+00> : vector<128xf32>
      %99 = vector.multi_reduction <add>, %98, %cst_31 [0] : vector<16x128xf32> to vector<128xf32>
      %100 = vector.shape_cast %99 : vector<128xf32> to vector<1x128xf32>
      %c6_i32 = arith.constant 6 : i32
      %101 = vector.broadcast %c6_i32 : i32 to vector<8x128xi32>
      %102 = arith.cmpi eq, %12, %101 : vector<8x128xi32>
      %103 = vector.shape_cast %100 : vector<1x128xf32> to vector<1x128xf32>
      %104 = vector.broadcast %103 : vector<1x128xf32> to vector<8x128xf32>
      %105 = arith.select %102, %104, %93 : vector<8x128xi1>, vector<8x128xf32>
      %106 = arith.select %102, %96, %94 : vector<8x128xi1>, vector<8x128xi32>
      %c1_i32_32 = arith.constant 1 : i32
      %107 = tpu.dynamic_rotate %95 by %c1_i32_32 dim 1 : vector<16x128xf32>, i32 -> vector<16x128xf32>
      %c1_i32_33 = arith.constant 1 : i32
      %108 = tpu.dynamic_rotate %96 by %c1_i32_33 dim 1 : vector<8x128xi32>, i32 -> vector<8x128xi32>
      %109 = arith.subf %4, %107 : vector<16x128xf32>
      %110 = math.absf %109 : vector<16x128xf32>
      %cst_34 = arith.constant dense<0.000000e+00> : vector<128xf32>
      %111 = vector.multi_reduction <add>, %110, %cst_34 [0] : vector<16x128xf32> to vector<128xf32>
      %112 = vector.shape_cast %111 : vector<128xf32> to vector<1x128xf32>
      %c7_i32 = arith.constant 7 : i32
      %113 = vector.broadcast %c7_i32 : i32 to vector<8x128xi32>
      %114 = arith.cmpi eq, %12, %113 : vector<8x128xi32>
      %115 = vector.shape_cast %112 : vector<1x128xf32> to vector<1x128xf32>
      %116 = vector.broadcast %115 : vector<1x128xf32> to vector<8x128xf32>
      %117 = arith.select %114, %116, %105 : vector<8x128xi1>, vector<8x128xf32>
      %118 = arith.select %114, %108, %106 : vector<8x128xi1>, vector<8x128xi32>
      %c1_i32_35 = arith.constant 1 : i32
      %119 = tpu.dynamic_rotate %107 by %c1_i32_35 dim 1 : vector<16x128xf32>, i32 -> vector<16x128xf32>
      %c1_i32_36 = arith.constant 1 : i32
      %120 = tpu.dynamic_rotate %108 by %c1_i32_36 dim 1 : vector<8x128xi32>, i32 -> vector<8x128xi32>
      %cst_37 = arith.constant 0.000000e+00 : f32
      %121 = vector.broadcast %cst_37 : f32 to vector<8x128xf32>
      %122 = arith.subf %121, %117 : vector<8x128xf32>
      %123 = math.exp %122 : vector<8x128xf32>
      %124 = vector.broadcast %9 : i32 to vector<8x128xi32>
      %125 = arith.cmpi slt, %118, %124 : vector<8x128xi32>
      %126 = arith.cmpi sgt, %118, %11 : vector<8x128xi32>
      %127 = vector.broadcast %10 : i1 to vector<8x128xi1>
      %128 = arith.ori %127, %126 : vector<8x128xi1>
      %129 = arith.andi %14, %125 : vector<8x128xi1>
      %130 = arith.andi %129, %128 : vector<8x128xi1>
      %cst_38 = arith.constant 0.000000e+00 : f32
      %131 = vector.broadcast %cst_38 : f32 to vector<8x128xf32>
      %132 = arith.select %130, %123, %131 : vector<8x128xi1>, vector<8x128xf32>
      %133 = arith.addf %arg9, %132 : vector<8x128xf32>
      scf.yield %119, %120, %133 : vector<16x128xf32>, vector<8x128xi32>, vector<8x128xf32>
    }
    %cst_5 = arith.constant dense<0.000000e+00> : vector<128xf32>
    %19 = vector.multi_reduction <add>, %18#2, %cst_5 [0] : vector<8x128xf32> to vector<128xf32>
    %20 = vector.shape_cast %19 : vector<128xf32> to vector<1x128xf32>
    %21 = vector.shape_cast %20 : vector<1x128xf32> to vector<1x1x128xf32>
    %c0_6 = arith.constant 0 : index
    %c0_7 = arith.constant 0 : index
    %c0_8 = arith.constant 0 : index
    %22 = vector.load %arg5[%c0_6, %c0_7, %c0_8] : memref<1x1x128xf32, #tpu.memory_space<vmem>>, vector<1x1x128xf32>
    tpu.vector_store %arg5[%c0_6, %c0_7, %c0_8], %21 {strides = array<i32>} : memref<1x1x128xf32, #tpu.memory_space<vmem>>, vector<1x1x128xf32>,
    return
  }
  func.func @transform_0(%arg0: i32, %arg1: memref<1xi32, #tpu.memory_space<smem>>, %arg2: memref<1xi32, #tpu.memory_space<smem>>) -> (i32, i32) {
    %0 = arith.index_cast %arg0 : i32 to index
    %1 = memref.load %arg1[%0] : memref<1xi32, #tpu.memory_space<smem>>
    %c0_i32 = arith.constant 0 : i32
    %c0_i32_0 = arith.constant 0 : i32
    return %c0_i32, %1 : i32, i32
  }
  func.func @transform_1(%arg0: i32, %arg1: memref<1xi32, #tpu.memory_space<smem>>, %arg2: memref<1xi32, #tpu.memory_space<smem>>) -> (i32, i32) {
    %0 = arith.index_cast %arg0 : i32 to index
    %1 = memref.load %arg2[%0] : memref<1xi32, #tpu.memory_space<smem>>
    %c0_i32 = arith.constant 0 : i32
    %c0_i32_0 = arith.constant 0 : i32
    return %c0_i32, %1 : i32, i32
  }
  func.func @transform_2(%arg0: i32, %arg1: memref<1xi32, #tpu.memory_space<smem>>, %arg2: memref<1xi32, #tpu.memory_space<smem>>) -> (i32, i32, i32) {
    %c0_i32 = arith.constant 0 : i32
    %c0_i32_0 = arith.constant 0 : i32
    %c0_i32_1 = arith.constant 0 : i32
    return %arg0, %c0_i32, %c0_i32_0 : i32, i32, i32
  }
}

</mosaic_0001>

<bundles_post_ra>
// kernel: tpu_custom_call.1
= control target key start
LH: loop header
LB: loop body
LE: loop exit
PB: predicated region body
PF: predicated region fallthrough
CT: control target
= control target key end

     0   :  { %11 = vsyncpa [#allocation6], 0  ;;  %s708_s0 = inlined_call_operand.<no memory space> [shape: s32[1], index: 0, kind: input, shape index: {}]   ;;  %s709_s1 = inlined_call_operand.<no memory space> [shape: s32[1], index: 1, kind: input, shape index: {}]   ;;  %s710_s2 = inlined_call_operand.hbm [shape: f32[16,128], index: 2, kind: input, shape index: {}]   ;;  %s711_s3 = inlined_call_operand.hbm [shape: f32[16,128], index: 3, kind: input, shape index: {}]   ;;  %s712_s4 = inlined_call_operand.hbm [shape: f32[1,1,128], index: 4, kind: output, shape index: {}]  }
   0x1   :  { %12 = vsyncpa [#allocation9], 0 }
   0x2   :  { %13 = vsyncpa [#allocation7], 0  ;;  %s297_s17 = sshll.u32 %s708_s0, 7  ;;  %s465_s23 = smov [#allocation5]  }
   0x3   :  { %s21_s22 = scalar_lea.hbm %s710_s2, %s297_s17  ;;  %s22_s24 = sshll.u32 %s465_s23, 4  ;;  %s23_s24 = int_to_ptr.vmem [resolvable:$true] %s22_s24 }
   0x4   :  { %s298_s27 = sshll.u32 %s709_s1, 7  ;;  %s349_s28 = scalar_lea.hbm %s21_s22, 256 }
   0x5   :  { %p350_p0 = scmp.ne.s32.totalorder %s21_s22, %s349_s28  ;;  %s351_s5 = scalar_lea.hbm %s710_s2, 256 }
   0x6   :  { %p352_p1 = scmp.lt.u32.totalorder %s21_s22, %s710_s2  ;;  %p353_p2 = scmp.lt.u32.totalorder %s351_s5, %s349_s28 }
   0x7   :  { %p355_p4 = scmp.lt.u32.totalorder %s349_s28, %s21_s22 }
   0x8   :  { %p354_p3 = por %p353_p2, %p352_p1 }
   0xa   :  { %p356_p5 = por %p355_p4, %p354_p3 }
   0xc   :  { %p357_p6 = pnand %p356_p5, %p350_p0 }
   0xe   :  { %360 = shalt.err (!%p357_p6)
}
   0xf   :  { %s361_s8 = scalar_lea.vmem %s23_s24, 256  ;;  %p366_p8 = scmp.lt.s32.totalorder %s23_s24, %s23_s24 }
  0x10   :  { %p362_p7 = scmp.ne.s32.totalorder %s23_s24, %s361_s8  ;;  %p367_p9 = scmp.lt.s32.totalorder %s361_s8, %s361_s8 }
  0x12   :  { %p368_p10 = por %p367_p9, %p366_p8 }
  0x14   :  { %p369_p11 = pnand %p368_p10, %p362_p7 }
  0x16   :  { %372 = shalt.err (!%p369_p11)
}
  0x17   :  { %s466_s9 = smov 128   ;;  %s467_s10 = smov 8  }
  0x18   :  { %28 = dma.hbm_to_vmem [thread:$0]  %s21_s22, 256, %s23_s24, [#allocation6], %s466_s9, %s466_s9, %s467_s10  }
  0x19   :  { %s36_s14 = scalar_lea.hbm %s711_s3, %s298_s27  ;;  %s468_s15 = smov [#allocation8]  }
  0x1a   :  { %s37_s16 = sshll.u32 %s468_s15, 4  ;;  %s373_s18 = scalar_lea.hbm %s36_s14, 256  ;;  %s38_s16 = int_to_ptr.vmem [resolvable:$true] %s37_s16 }
  0x1b   :  { %p374_p12 = scmp.ne.s32.totalorder %s36_s14, %s373_s18  ;;  %s375_s21 = scalar_lea.hbm %s711_s3, 256 }
  0x1c   :  { %p376_p13 = scmp.lt.u32.totalorder %s36_s14, %s711_s3  ;;  %p377_p0 = scmp.lt.u32.totalorder %s375_s21, %s373_s18 }
  0x1d   :  { %p379_p2 = scmp.lt.u32.totalorder %s373_s18, %s36_s14 }
  0x1e   :  { %p378_p1 = por %p377_p0, %p376_p13 }
  0x20   :  { %p380_p3 = por %p379_p2, %p378_p1 }
  0x22   :  { %p381_p4 = pnand %p380_p3, %p374_p12 }
  0x24   :  { %384 = shalt.err (!%p381_p4)
}
  0x25   :  { %s385_s22 = scalar_lea.vmem %s38_s16, 256  ;;  %p390_p6 = scmp.lt.s32.totalorder %s38_s16, %s38_s16 }
  0x26   :  { %p386_p5 = scmp.ne.s32.totalorder %s38_s16, %s385_s22  ;;  %p391_p7 = scmp.lt.s32.totalorder %s385_s22, %s385_s22 }
  0x28   :  { %p392_p8 = por %p391_p7, %p390_p6 }
  0x2a   :  { %p393_p9 = pnand %p392_p8, %p386_p5 }
  0x2c   :  { %396 = shalt.err (!%p393_p9)
}
  0x2d   :  { %43 = dma.hbm_to_vmem [thread:$0]  %s36_s14, 256, %s38_s16, [#allocation9], %s466_s9, %s466_s9, %s467_s10  }
  0x2e   :  { %439 = dma.done.wait [#allocation6], 256  }
  0x2f   :  { %440 = vsyncadd [#allocation6], 4294967040 }
  0x30   :  { %441 = dma.done.wait [#allocation9], 256  }
  0x31   :  { %442 = vsyncadd [#allocation9], 4294967040  ;;  %s59_s26 = ssub.s32 20, %s297_s17  ;;  %s536_s30 = ssub.s32 20, %s298_s27  ;;  %v63_v0 = vlaneseq  ;;  %v553_v5 = vld [vmem:[#allocation5] sm:$0xff]  ;;  %v555_v6 = vld [vmem:[#allocation5 + $0x8] sm:$0xff] }
  0x32   :  { %p62_p10 = scmp.ne.s32.totalorder %s709_s1, %s708_s0  ;;  %v67_v1 = vstv %s59_s26  ;;  %v56_v7 = vld [vmem:[#allocation8] sm:$0xff]   ;;  %v57_v8 = vld [vmem:[#allocation8 + $0x8] sm:$0xff]   ;;  %v557_v9 = vmov 0.0   ;;  %s566_s17 = smov 0  }
  0x33   :  { %v544_v2 = vand.u32 127, %v63_v0   ;;  %v546_v3 = vshrl.u32 %v63_v0, 7 }
  0x35   :  { %vm549_vm0 = vcmp.lt.s32.totalorder %v544_v2, %v67_v1  ;;  %v715_v10 = vmov %v544_v2 }
  0x36 LB: > { %s469_s27 = smov 1   ;;  %v79_v11 = vsub.f32 %v553_v5, %v459_v7  ;;  %v80_v12 = vsub.f32 %v555_v6, %v455_v8  ;;  %vm90_vm1 = vcmp.eq.s32.totalorder %v546_v3, 0  ;;  %vm110_vm2 = vcmp.eq.s32.totalorder %v546_v3, 1  ;;  %s74_s17 = sadd.s32 1, %s463_s17   ;;  %s463_s17 = sphi %s566_s17, %s74_s17   ;;  %v459_v7 = vphi %v56_v7, %v234_v7   ;;  %v455_v8 = vphi %v57_v8, %v236_v8   ;;  %v451_v10 = vphi %v715_v10, %v238_v10   ;;  %v447_v9 = vphi %v557_v9, %v716_v9  }
  0x37   : > { %93 = vrot.lane.b32.xlu0 %v459_v7, %s469_s27  ;;  %97 = vrot.lane.b32.xlu1 %v451_v10, %s469_s27  ;;  %vm130_vm3 = vcmp.eq.s32.totalorder %v546_v3, 2  ;;  %vm150_vm4 = vcmp.eq.s32.totalorder %v546_v3, 3  ;;  %vm170_vm5 = vcmp.eq.s32.totalorder %v546_v3, 4  ;;  %vm190_vm6 = vcmp.eq.s32.totalorder %v546_v3, 5  ;;  %s245_s2 = scalar_select %p62_p10, 1, 0 }
  0x38   : > { %v81_v13 = vand.u32 2147483647, %v79_v11  ;;  %v82_v14 = vand.u32 2147483647, %v80_v12  ;;  %vm210_vm7 = vcmp.eq.s32.totalorder %v546_v3, 6  ;;  %vm230_vm8 = vcmp.eq.s32.totalorder %v546_v3, 7 }
  0x39   : > { %p71_p11 = scmp.ge.s32.totalorder %s74_s17, 16  }
  0x3a   : > { %v83_v15 = vadd.f32 %v82_v14, %v81_v13  ;;  %s470_s13 = smov (%p71_p11), [#allocation10]  }
  0x3b   : > { %95 = vrot.lane.b32.xlu0 %v455_v8, %s469_s27  ;;  %s266_s14 = sshll.u32 (%p71_p11), %s470_s13, 4  ;;  %s267_s14 = int_to_ptr.vmem [resolvable:$true] %s266_s14 }
  0x3c   : > { %v84_v16 = vrot.slane %v83_v15, 4  ;;  %s397_s15 = scalar_lea.vmem (%p71_p11), %s267_s14, 16  ;;  %s401_s16 = scalar_lea.vmem (%p71_p11), %s267_s14, 32 }
  0x3d   :  { %p398_p12 = scmp.ne.s32.totalorder (%p71_p11), %s267_s14, %s397_s15  ;;  %p402_p13 = scmp.lt.s32.totalorder (%p71_p11), %s267_s14, %s267_s14 }
  0x3e   : > { %v85_v17 = vadd.f32 %v84_v16, %v83_v15  ;;  %p403_p0 = scmp.lt.s32.totalorder (%p71_p11), %s401_s16, %s397_s15 }
  0x40   : > { %v86_v21 = vrot.slane %v85_v17, 2  ;;  %p404_p1 = por (%p71_p11), %p403_p0, %p402_p13 }
  0x42   : > { %v87_v26 = vadd.f32 %v86_v21, %v85_v17  ;;  %p405_p2 = pnand (%p71_p11), %p404_p1, %p398_p12 }
  0x44   : > { %v88_v29 = vrot.slane %v87_v26, 1 }
  0x46   : > { %v89_v32 = vadd.f32 %v88_v29, %v87_v26 }
  0x48   : > { %v91_v35 = vsel %vm90_vm1, %v89_v32, 0.0 }
  0xa9   : > { %v94_v18 = vpop.permute.xlu0 %93  ;;  %v586_v19 = vpop.permute.xlu1 %97 }
  0xaa   : > { %113 = vrot.lane.b32.xlu1 %v94_v18, %s469_s27  ;;  %v99_v20 = vsub.f32 %v553_v5, %v94_v18 }
  0xac   : > { %v101_v24 = vand.u32 2147483647, %v99_v20 }
  0xad   : > { %v96_v22 = vpop.permute.xlu0 %95 }
  0xae   : > { %v100_v23 = vsub.f32 %v555_v6, %v96_v22  ;;  %115 = vrot.lane.b32.xlu0 %v96_v22, %s469_s27  ;;  %117 = vrot.lane.b32.xlu1 %v586_v19, %s469_s27 }
  0xb0   : > { %v102_v25 = vand.u32 2147483647, %v100_v23 }
  0xb2   : > { %v103_v27 = vadd.f32 %v102_v25, %v101_v24 }
  0xb4   : > { %v104_v28 = vrot.slane %v103_v27, 4 }
  0xb6   : > { %v105_v30 = vadd.f32 %v104_v28, %v103_v27 }
  0xb8   : > { %v106_v31 = vrot.slane %v105_v30, 2 }
  0xba   : > { %v107_v33 = vadd.f32 %v106_v31, %v105_v30 }
  0xbc   : > { %v108_v34 = vrot.slane %v107_v33, 1 }
  0xbe   : > { %v109_v36 = vadd.f32 %v108_v34, %v107_v33 }
  0xc0   : > { %v111_v37 = vsel %vm110_vm2, %v109_v36, %v91_v35 }
 0x11c   : > { %v114_v38 = vpop.permute.xlu1 %113 }
 0x11d   : > { %133 = vrot.lane.b32.xlu0 %v114_v38, %s469_s27  ;;  %v119_v39 = vsub.f32 %v553_v5, %v114_v38 }
 0x11f   : > { %v121_v43 = vand.u32 2147483647, %v119_v39 }
 0x120   : > { %v116_v40 = vpop.permute.xlu0 %115  ;;  %v601_v41 = vpop.permute.xlu1 %117 }
 0x121   : > { %v120_v42 = vsub.f32 %v555_v6, %v116_v40  ;;  %135 = vrot.lane.b32.xlu1 %v116_v40, %s469_s27  ;;  %137 = vrot.lane.b32.xlu0 %v601_v41, %s469_s27 }
 0x123   : > { %v122_v44 = vand.u32 2147483647, %v120_v42 }
 0x125   : > { %v123_v45 = vadd.f32 %v122_v44, %v121_v43 }
 0x127   : > { %v124_v46 = vrot.slane %v123_v45, 4 }
 0x129   : > { %v125_v47 = vadd.f32 %v124_v46, %v123_v45 }
 0x12b   : > { %v126_v48 = vrot.slane %v125_v47, 2 }
 0x12d   : > { %v127_v49 = vadd.f32 %v126_v48, %v125_v47 }
 0x12f   : > { %v128_v50 = vrot.slane %v127_v49, 1 }
 0x131   : > { %v129_v51 = vadd.f32 %v128_v50, %v127_v49 }
 0x133   : > { %v131_v52 = vsel %vm130_vm3, %v129_v51, %v111_v37 }
 0x18f   : > { %v134_v53 = vpop.permute.xlu0 %133 }
 0x190   : > { %153 = vrot.lane.b32.xlu1 %v134_v53, %s469_s27  ;;  %v139_v54 = vsub.f32 %v553_v5, %v134_v53 }
 0x192   : > { %v141_v58 = vand.u32 2147483647, %v139_v54 }
 0x193   : > { %v612_v55 = vpop.permute.xlu0 %137  ;;  %v136_v56 = vpop.permute.xlu1 %135 }
 0x194   : > { %v140_v57 = vsub.f32 %v555_v6, %v136_v56  ;;  %157 = vrot.lane.b32.xlu1 %v612_v55, %s469_s27  ;;  %155 = vrot.lane.b32.xlu0 %v136_v56, %s469_s27 }
 0x196   : > { %v142_v59 = vand.u32 2147483647, %v140_v57 }
 0x198   : > { %v143_v60 = vadd.f32 %v142_v59, %v141_v58 }
 0x19a   : > { %v144_v61 = vrot.slane %v143_v60, 4 }
 0x19c   : > { %v145_v62 = vadd.f32 %v144_v61, %v143_v60 }
 0x19e   : > { %v146_v63 = vrot.slane %v145_v62, 2 }
 0x1a0   : > { %v147_v0 = vadd.f32 %v146_v63, %v145_v62 }
 0x1a2   : > { %v148_v1 = vrot.slane %v147_v0, 1 }
 0x1a4   : > { %v149_v7 = vadd.f32 %v148_v1, %v147_v0 }
 0x1a6   : > { %v151_v8 = vsel %vm150_vm4, %v149_v7, %v131_v52 }
 0x202   : > { %v154_v11 = vpop.permute.xlu1 %153 }
 0x203   : > { %173 = vrot.lane.b32.xlu0 %v154_v11, %s469_s27  ;;  %v159_v12 = vsub.f32 %v553_v5, %v154_v11 }
 0x205   : > { %v161_v16 = vand.u32 2147483647, %v159_v12 }
 0x206   : > { %v156_v13 = vpop.permute.xlu0 %155  ;;  %v623_v14 = vpop.permute.xlu1 %157 }
 0x207   : > { %v160_v15 = vsub.f32 %v555_v6, %v156_v13  ;;  %175 = vrot.lane.b32.xlu1 %v156_v13, %s469_s27  ;;  %177 = vrot.lane.b32.xlu0 %v623_v14, %s469_s27 }
 0x209   : > { %v162_v17 = vand.u32 2147483647, %v160_v15  ;;  %v92_v15 = vsel %vm90_vm1, %v451_v10, 0 }
 0x20b   : > { %v163_v18 = vadd.f32 %v162_v17, %v161_v16 }
 0x20d   : > { %v164_v20 = vrot.slane %v163_v18, 4 }
 0x20f   : > { %v165_v21 = vadd.f32 %v164_v20, %v163_v18  ;;  %v112_v18 = vsel %vm110_vm2, %v586_v19, %v92_v15 }
 0x210   : > { %v132_v20 = vsel %vm130_vm3, %v601_v41, %v112_v18 }
 0x211   : > { %v166_v22 = vrot.slane %v165_v21, 2 }
 0x213   : > { %v167_v23 = vadd.f32 %v166_v22, %v165_v21  ;;  %v152_v22 = vsel %vm150_vm4, %v612_v55, %v132_v20 }
 0x214   : > { %v172_v19 = vsel %vm170_vm5, %v623_v14, %v152_v22 }
 0x215   : > { %v168_v24 = vrot.slane %v167_v23, 1 }
 0x217   : > { %v169_v25 = vadd.f32 %v168_v24, %v167_v23  ;;  %v246_v24 = vstv %s245_s2 }
 0x218   : > { %vm247_vm9 = vcmp.eq.s32.totalorder %v246_v24, 1 }
 0x219   : > { %v171_v26 = vsel %vm170_vm5, %v169_v25, %v151_v8 }
 0x275   : > { %v174_v27 = vpop.permute.xlu0 %173 }
 0x276   : > { %193 = vrot.lane.b32.xlu1 %v174_v27, %s469_s27  ;;  %v179_v28 = vsub.f32 %v553_v5, %v174_v27 }
 0x278   : > { %v181_v32 = vand.u32 2147483647, %v179_v28 }
 0x279   : > { %v178_v29 = vpop.permute.xlu0 %177  ;;  %v176_v30 = vpop.permute.xlu1 %175 }
 0x27a   : > { %v180_v31 = vsub.f32 %v555_v6, %v176_v30  ;;  %197 = vrot.lane.b32.xlu1 %v178_v29, %s469_s27  ;;  %195 = vrot.lane.b32.xlu0 %v176_v30, %s469_s27  ;;  %v192_v41 = vsel %vm190_vm6, %v178_v29, %v172_v19 }
 0x27c   : > { %v182_v33 = vand.u32 2147483647, %v180_v31 }
 0x27e   : > { %v183_v34 = vadd.f32 %v182_v33, %v181_v32 }
 0x280   : > { %v184_v35 = vrot.slane %v183_v34, 4 }
 0x282   : > { %v185_v36 = vadd.f32 %v184_v35, %v183_v34 }
 0x284   : > { %v186_v37 = vrot.slane %v185_v36, 2 }
 0x286   : > { %v187_v38 = vadd.f32 %v186_v37, %v185_v36 }
 0x288   : > { %v188_v39 = vrot.slane %v187_v38, 1 }
 0x28a   : > { %v189_v40 = vadd.f32 %v188_v39, %v187_v38 }
 0x28c   : > { %v191_v42 = vsel %vm190_vm6, %v189_v40, %v171_v26  ;;  %v242_v26 = vstv %s536_s30 }
 0x2e8   : > { %v194_v43 = vpop.permute.xlu1 %193 }
 0x2e9   : > { %213 = vrot.lane.b32.xlu0 %v194_v43, %s469_s27  ;;  %v199_v44 = vsub.f32 %v553_v5, %v194_v43 }
 0x2eb   : > { %v201_v48 = vand.u32 2147483647, %v199_v44 }
 0x2ec   : > { %v196_v45 = vpop.permute.xlu0 %195  ;;  %v198_v46 = vpop.permute.xlu1 %197 }
 0x2ed   : > { %v200_v47 = vsub.f32 %v555_v6, %v196_v45  ;;  %215 = vrot.lane.b32.xlu1 %v196_v45, %s469_s27  ;;  %217 = vrot.lane.b32.xlu0 %v198_v46, %s469_s27  ;;  %v212_v55 = vsel %vm210_vm7, %v198_v46, %v192_v41 }
 0x2ef   : > { %v202_v49 = vand.u32 2147483647, %v200_v47 }
 0x2f1   : > { %v203_v50 = vadd.f32 %v202_v49, %v201_v48 }
 0x2f3   : > { %v204_v51 = vrot.slane %v203_v50, 4 }
 0x2f5   : > { %v205_v52 = vadd.f32 %v204_v51, %v203_v50 }
 0x2f7   : > { %v206_v53 = vrot.slane %v205_v52, 2 }
 0x2f9   : > { %v207_v54 = vadd.f32 %v206_v53, %v205_v52 }
 0x2fb   : > { %v208_v56 = vrot.slane %v207_v54, 1 }
 0x2fd   : > { %v209_v57 = vadd.f32 %v208_v56, %v207_v54 }
 0x2ff   : > { %v211_v58 = vsel %vm210_vm7, %v209_v57, %v191_v42 }
 0x35b   : > { %v214_v59 = vpop.permute.xlu0 %213 }
 0x35c   : > { %233 = vrot.lane.b32.xlu1 %v214_v59, %s469_s27  ;;  %v219_v60 = vsub.f32 %v553_v5, %v214_v59 }
 0x35e   : > { %v221_v0 = vand.u32 2147483647, %v219_v60 }
 0x35f   : > { %v218_v61 = vpop.permute.xlu0 %217  ;;  %v216_v62 = vpop.permute.xlu1 %215 }
 0x360   : > { %v220_v63 = vsub.f32 %v555_v6, %v216_v62  ;;  %237 = vrot.lane.b32.xlu1 %v218_v61, %s469_s27  ;;  %235 = vrot.lane.b32.xlu0 %v216_v62, %s469_s27  ;;  %v232_v25 = vsel %vm230_vm8, %v218_v61, %v212_v55 }
 0x361   : > { %vm244_vm10 = vcmp.gt.s32.totalorder %v232_v25, %v544_v2  ;;  %vm243_vm11 = vcmp.lt.s32.totalorder %v232_v25, %v242_v26 }
 0x362   : > { %v222_v1 = vand.u32 2147483647, %v220_v63  ;;  %vm248_vm12 = vmor %vm247_vm9, %vm244_vm10 }
 0x363   : > { %vm249_vm13 = vmand %vm549_vm0, %vm243_vm11 }
 0x364   : > { %v223_v7 = vadd.f32 %v222_v1, %v221_v0  ;;  %vm250_vm14 = vmand %vm249_vm13, %vm248_vm12 }
 0x366   : > { %v224_v8 = vrot.slane %v223_v7, 4 }
 0x368   : > { %v225_v11 = vadd.f32 %v224_v8, %v223_v7 }
 0x36a   : > { %v226_v12 = vrot.slane %v225_v11, 2 }
 0x36c   : > { %v227_v13 = vadd.f32 %v226_v12, %v225_v11 }
 0x36e   : > { %v228_v16 = vrot.slane %v227_v13, 1 }
 0x370   : > { %v229_v17 = vadd.f32 %v228_v16, %v227_v13 }
 0x372   : > { %v231_v21 = vsel %vm230_vm8, %v229_v17, %v211_v58 }
 0x373   : > { %v239_v10 = vsub.f32 0.0, %v231_v21 }
 0x375   : > { %v240_v23 = vmul.f32 1.442695, %v239_v10 }
 0x377   : > { %347 = vpow2.f32 %v240_v23 }
 0x381   : > { %v348_v14 = vpop.eup %347 }
 0x382   : > { %v251_v27 = vsel %vm250_vm14, %v348_v14, 0.0 }
 0x383   : > { %v252_v28 = vadd.f32 %v447_v9, %v251_v27  }
 0x385   : > { %v716_v9 = vmov %v252_v28  ;;  %v253_v29 = vrot.slane (%p71_p11), %v252_v28, 4 }
 0x387   :  { %v254_v30 = vadd.f32 (%p71_p11), %v253_v29, %v252_v28 }
 0x389   :  { %v255_v31 = vrot.slane (%p71_p11), %v254_v30, 2 }
 0x38b   :  { %v256_v32 = vadd.f32 (%p71_p11), %v255_v31, %v254_v30 }
 0x38d   :  { %v257_v33 = vrot.slane (%p71_p11), %v256_v32, 1 }
 0x38f   :  { %v258_v34 = vadd.f32 (%p71_p11), %v257_v33, %v256_v32 }
 0x391   :  { %259 = vst [vmem:[#allocation10] sm:$0x1] (%p71_p11), %v258_v34 }
 0x3cc   :  { %73 = sbr.rel (!%p71_p11) target bundleno = 54 (0x36), region = 45 }
 0x3ce   : > { %v234_v7 = vpop.permute.xlu1 %233  }
 0x3d2   : > { %v236_v8 = vpop.permute.xlu0 %235   ;;  %v238_v10 = vpop.permute.xlu1 %237  }
 0x3d3   :  { %408 = shalt.err (!%p405_p2)
}
 0x3d4   :  { %s409_s0 = scalar_lea.hbm %s712_s4, 16 }
 0x3d5   :  { %p410_p3 = scmp.ne.s32.totalorder %s712_s4, %s409_s0  ;;  %p413_p4 = scmp.lt.u32.totalorder %s409_s0, %s712_s4 }
 0x3d7   :  { %p415_p5 = pnand %p413_p4, %p410_p3 }
 0x3d9   :  { %418 = shalt.err (!%p415_p5)
}
 0x3da   :  { %269 = dma.vmem_to_hbm [thread:$0]  %s267_s14, 16, %s712_s4, [#allocation7]  }
 0x3db   :  { %443 = dma.done.wait [#allocation7], 16  }
 0x3dc   :  { %444 = vsyncadd [#allocation7], 4294967280 }
 0x3dd   :  { %273 = vsyncpa [#allocation6], 1 }
 0x3de   :  { %274 = vsyncpa [#allocation9], 1 }
 0x3df   :  { %275 = vsyncpa [#allocation7], 1 }

</bundles_post_ra>
